<compile_context>
chip_gen: v6e
topology: v6e:2x2x1
jax: 0.10.0
libtpu: 0.0.40
codegen_flags: <defaults>
</compile_context>

<pallas_src>
import jax
import jax.numpy as jnp
from jax.experimental import pallas as pl
from jax.experimental.pallas import tpu as pltpu


def _attention_kernel(enc_ref, dec_ref, wet_ref, wdt_ref, wv_ref,
                      ctx_ref, attn_ref):
    enc = enc_ref[...]          # (TB, S, Ep)  bf16
    dec = dec_ref[...]          # (TB, D)      bf16
    wet = wet_ref[...]          # (Ep, Ap)     bf16, pre-transposed encoder weight
    wdt = wdt_ref[...]          # (D, Ap)      bf16, pre-transposed decoder weight
    wv = wv_ref[...]            # (1, Ap)      f32, value weight (lane-major)

    TB, S, Ep = enc.shape
    Ap = wet.shape[1]

    # One fused (TB*S, Ep) @ (Ep, Ap) projection on the MXU (bf16 in, f32 acc).
    e_proj = jnp.dot(enc.reshape(TB * S, Ep), wet,
                     preferred_element_type=jnp.float32).reshape(TB, S, Ap)
    # Decoder projection: (TB, D) @ (D, Ap).
    d_proj = jnp.dot(dec, wdt, preferred_element_type=jnp.float32)      # (TB, Ap)

    # attn_hidden = tanh(enc_proj + dec_proj broadcast over the sequence).
    # tanh in bf16: uses the bf16 EUP path on v6e/v7x (plain f32 rate on v5e).
    h = jnp.tanh((e_proj + d_proj[:, None, :]).astype(jnp.bfloat16))    # (TB, S, Ap)

    # score[b, s] = <h[b, s, :], wv>  ->  lane-dense (TB, S), f32 via wv (f32).
    score = jnp.sum(h * wv, axis=-1)                                    # (TB, S)

    # Softmax over the sequence (lane) axis; exact division (tiny operand).
    m = jnp.max(score, axis=-1, keepdims=True)                          # (TB, 1)
    ex = jnp.exp(score - m)                                             # (TB, S)
    attn_w = ex / jnp.sum(ex, axis=-1, keepdims=True)                   # (TB, S) f32

    # Context via MXU batched matmul: (TB,1,S) @ (TB,S,Ep) -> (TB,1,Ep),
    # then stored as a dense 2-D (TB, Ep) block.
    ctx = jnp.einsum('bqs,bse->bqe',
                     attn_w[:, None, :].astype(jnp.bfloat16), enc,
                     preferred_element_type=jnp.float32)                # (TB, 1, Ep)

    attn_ref[...] = attn_w.astype(attn_ref.dtype)                       # lane-dense
    ctx_ref[...] = ctx.reshape(TB, Ep).astype(ctx_ref.dtype)            # sublane+lane dense


def _round_up(x, m):
    return (x + m - 1) // m * m


def _vmem_budget_bytes():
    """~75% of this chip's VMEM (64 MiB on v7x, 128 MiB on v5e/v6e), capped at
    96 MiB, with a 48 MiB fallback that is safe on every generation."""
    cap = 64 * 1024 * 1024
    try:
        cap = int(pltpu.get_tpu_info().vmem_capacity_bytes)
    except Exception:
        pass
    return min(int(cap * 0.75), 96 * 1024 * 1024)


def _choose_tb(B, S, Ep, Ap, D, vmem_budget):
    """Batch tile: largest multiple of 8 dividing B that fits the per-step
    VMEM budget; if the whole batch fits, still prefer >= 2 grid steps so the
    'parallel' axis can shard across both TensorCores on v7x."""
    if B % 8 != 0:
        return B            # block-shape rule: tb must be 8-aligned or == B
    per_row = (2 * S * Ep * 2          # enc tile (bf16, double-buffered)
               + 2 * D * 2             # dec tile (bf16, double-buffered)
               + 2 * Ep * 4 + 2 * S * 4  # outputs (double-buffered)
               + 2 * S * Ap * 4        # e_proj / h intermediates
               + S * Ep * 4)           # headroom for relayouts / ctx matmul
    weight_bytes = 2 * 2 * (Ep * Ap + D * Ap) + 2 * Ap * 4
    cap_rows = max((vmem_budget - weight_bytes) // per_row, 8)
    cands = [t for t in range(8, B + 1, 8) if B % t == 0 and t <= cap_rows]
    if not cands:
        return 8
    tb = max(cands)
    if tb == B:
        smaller = [t for t in cands if t <= B // 2]
        if smaller:
            tb = max(smaller)   # >= 2 steps -> both v7x TCs get work
    return tb


def bahdanau_attention(encoder_out, decoder_hidden, we, wd, wv, *, tb=None):
    """encoder_out: [B,S,E], decoder_hidden: [B,D],
       we: [A,E], wd: [A,D], wv: [1,A]  (PyTorch Linear weight layout, no bias)
       -> (context [B,E], attn_weights [B,S,1])."""
    B, S, E = encoder_out.shape
    D = decoder_hidden.shape[-1]
    A = we.shape[0]
    out_dtype = encoder_out.dtype

    # Lane-pad the feature dims to 128 for dense vregs / unmasked stores.
    Ep = _round_up(E, 128)
    Ap = _round_up(A, 128)

    budget = _vmem_budget_bytes()
    if tb is None:
        tb = _choose_tb(B, S, Ep, Ap, D, budget)
    assert B % tb == 0, "batch tile must divide batch size"
    assert tb == B or tb % 8 == 0, "tb must be a multiple of 8 (or equal B)"
    num_tiles = B // tb

    # bf16 inputs for the MXU path; pads and transposes happen once at trace
    # time in the wrapper (they fuse with the cast).
    cdt = jnp.bfloat16
    enc_p = encoder_out
    if Ep != E:
        enc_p = jnp.pad(enc_p, ((0, 0), (0, 0), (0, Ep - E)))
    enc_p = enc_p.astype(cdt)
    dec_p = decoder_hidden.astype(cdt)

    we_t = we.T                                           # (E, A)
    wd_t = wd.T                                           # (D, A)
    if Ep != E or Ap != A:
        we_t = jnp.pad(we_t, ((0, Ep - E), (0, Ap - A)))
    if Ap != A:
        wd_t = jnp.pad(wd_t, ((0, 0), (0, Ap - A)))
        wv_p = jnp.pad(wv, ((0, 0), (0, Ap - A)))
    else:
        wv_p = wv
    we_t = we_t.astype(cdt)
    wd_t = wd_t.astype(cdt)
    wv_p = wv_p.astype(jnp.float32)                       # score stays f32

    ctx_p, attn2 = pl.pallas_call(
        _attention_kernel,
        out_shape=(
            jax.ShapeDtypeStruct((B, Ep), out_dtype),     # context (lane-padded)
            jax.ShapeDtypeStruct((B, S), out_dtype),      # attn weights (lane-dense)
        ),
        grid_spec=pltpu.PrefetchScalarGridSpec(
            num_scalar_prefetch=0,
            grid=(num_tiles,),
            in_specs=[
                pl.BlockSpec((tb, S, Ep), lambda i: (i, 0, 0)),   # encoder tile
                pl.BlockSpec((tb, D), lambda i: (i, 0)),          # decoder tile
                pl.BlockSpec((Ep, Ap), lambda i: (0, 0)),         # enc weight (pre-T)
                pl.BlockSpec((D, Ap), lambda i: (0, 0)),          # dec weight (pre-T)
                pl.BlockSpec((1, Ap), lambda i: (0, 0)),          # value weight
            ],
            out_specs=(
                pl.BlockSpec((tb, Ep), lambda i: (i, 0)),         # context (2-D dense)
                pl.BlockSpec((tb, S), lambda i: (i, 0)),          # attn weights
            ),
        ),
        compiler_params=pltpu.CompilerParams(
            dimension_semantics=("parallel",),
            vmem_limit_bytes=budget,
        ),
    )(enc_p, dec_p, we_t, wd_t, wv_p)

    ctx = ctx_p[:, :E] if Ep != E else ctx_p              # drop lane padding
    return ctx, attn2.reshape(B, S, 1)                    # metadata reshape only


def _reference(encoder_out, decoder_hidden, we, wd, wv):
    """Plain-JAX f32 mirror of the PyTorch forward, for correctness check."""
    hidden_ = decoder_hidden[:, None, :]                      # (B,1,D)
    attn_hidden = jnp.tanh(encoder_out @ we.T + hidden_ @ wd.T)
    score = attn_hidden @ wv.T                                # (B,S,1)
    attn_weights = jax.nn.softmax(score, axis=1)
    context = jnp.sum(attn_weights * encoder_out, axis=1)     # (B,E)
    return context, attn_weights


if __name__ == "__main__":
    B, S = 2, 8
    encoder_dim, decoder_dim, attention_dim = 32, 32, 32

    key = jax.random.PRNGKey(0)
    k1, k2, k3, k4, k5 = jax.random.split(key, 5)

    encoder_out = jax.random.normal(k1, (B, S, encoder_dim), dtype=jnp.float32)
    decoder_hidden = jax.random.normal(k2, (B, decoder_dim), dtype=jnp.float32)

    # PyTorch Linear weight convention: [out_features, in_features], no bias.
    we = jax.random.normal(k3, (attention_dim, encoder_dim), dtype=jnp.float32) * 0.1
    wd = jax.random.normal(k4, (attention_dim, decoder_dim), dtype=jnp.float32) * 0.1
    wv = jax.random.normal(k5, (1, attention_dim), dtype=jnp.float32) * 0.1

    ctx, attn = bahdanau_attention(encoder_out, decoder_hidden, we, wd, wv)
    jax.block_until_ready((ctx, attn))

    ctx_ref, attn_ref = _reference(encoder_out, decoder_hidden, we, wd, wv)
    assert ctx.shape == (B, encoder_dim)
    assert attn.shape == (B, S, 1)
    # Softmax division is now exact; remaining tolerance covers the bf16
    # MXU path (bf16 inputs/weights + bf16 tanh), ~1e-2 relative worst case.
    assert jnp.allclose(ctx, ctx_ref, atol=2e-2, rtol=2e-2)
    assert jnp.allclose(attn, attn_ref, atol=2e-2, rtol=2e-2)

    print("KERNEL_OK")
</pallas_src>

<mosaic_0001>
module attributes {stable_mosaic.version = 11 : i64} {
  func.func @_attention_kernel(%arg0: i32, %arg1: memref<2x8x128xbf16, #tpu.memory_space<vmem>>, %arg2: memref<2x32xbf16, #tpu.memory_space<vmem>>, %arg3: memref<128x128xbf16, #tpu.memory_space<vmem>>, %arg4: memref<32x128xbf16, #tpu.memory_space<vmem>>, %arg5: memref<1x128xf32, #tpu.memory_space<vmem>>, %arg6: memref<2x128xf32, #tpu.memory_space<vmem>>, %arg7: memref<2x8xf32, #tpu.memory_space<vmem>>) attributes {dimension_semantics = [#tpu.dimension_semantics<parallel>], iteration_bounds = array<i64: 1>, scalar_prefetch = 0 : i64, scratch_operands = 0 : i64, tpu.core_type = #tpu.core_type<tc>, window_params = [{transform_indices = @transform_0, window_bounds = array<i64: 2, 8, 128>}, {transform_indices = @transform_1, window_bounds = array<i64: 2, 32>}, {pipeline_mode = #tpu.pipeline_mode<synchronous>, transform_indices = @transform_2, window_bounds = array<i64: 128, 128>}, {pipeline_mode = #tpu.pipeline_mode<synchronous>, transform_indices = @transform_3, window_bounds = array<i64: 32, 128>}, {pipeline_mode = #tpu.pipeline_mode<synchronous>, transform_indices = @transform_4, window_bounds = array<i64: 1, 128>}, {transform_indices = @transform_5, window_bounds = array<i64: 2, 128>}, {transform_indices = @transform_6, window_bounds = array<i64: 2, 8>}]} {
    %c0 = arith.constant 0 : index
    %c0_0 = arith.constant 0 : index
    %c0_1 = arith.constant 0 : index
    %0 = vector.load %arg1[%c0, %c0_0, %c0_1] : memref<2x8x128xbf16, #tpu.memory_space<vmem>>, vector<2x8x128xbf16>
    %c0_2 = arith.constant 0 : index
    %c0_3 = arith.constant 0 : index
    %1 = vector.load %arg2[%c0_2, %c0_3] : memref<2x32xbf16, #tpu.memory_space<vmem>>, vector<2x32xbf16>
    %c0_4 = arith.constant 0 : index
    %c0_5 = arith.constant 0 : index
    %2 = vector.load %arg3[%c0_4, %c0_5] : memref<128x128xbf16, #tpu.memory_space<vmem>>, vector<128x128xbf16>
    %c0_6 = arith.constant 0 : index
    %c0_7 = arith.constant 0 : index
    %3 = vector.load %arg4[%c0_6, %c0_7] : memref<32x128xbf16, #tpu.memory_space<vmem>>, vector<32x128xbf16>
    %c0_8 = arith.constant 0 : index
    %c0_9 = arith.constant 0 : index
    %4 = vector.load %arg5[%c0_8, %c0_9] : memref<1x128xf32, #tpu.memory_space<vmem>>, vector<1x128xf32>
    %5 = vector.shape_cast %0 : vector<2x8x128xbf16> to vector<16x128xbf16>
    %cst = arith.constant dense<0.000000e+00> : vector<16x128xf32>
    %6 = tpu.matmul %5, %2, %cst {dimension_numbers = #tpu.dot_dimension_numbers<[1], [0], [0], [1], [0, 0, 1, 1], [], []>} : vector<16x128xbf16>, vector<128x128xbf16>, vector<16x128xf32> -> vector<16x128xf32>
    %7 = vector.shape_cast %6 : vector<16x128xf32> to vector<2x8x128xf32>
    %cst_10 = arith.constant dense<0.000000e+00> : vector<2x128xf32>
    %8 = tpu.matmul %1, %3, %cst_10 {dimension_numbers = #tpu.dot_dimension_numbers<[1], [0], [0], [1], [0, 0, 1, 1], [], []>} : vector<2x32xbf16>, vector<32x128xbf16>, vector<2x128xf32> -> vector<2x128xf32>
    %9 = vector.shape_cast %8 : vector<2x128xf32> to vector<2x1x128xf32>
    %10 = vector.broadcast %9 : vector<2x1x128xf32> to vector<2x8x128xf32>
    %11 = arith.addf %7, %10 : vector<2x8x128xf32>
    %12 = arith.truncf %11 : vector<2x8x128xf32> to vector<2x8x128xbf16>
    %13 = math.tanh %12 : vector<2x8x128xbf16>
    %14 = arith.extf %13 : vector<2x8x128xbf16> to vector<2x8x128xf32>
    %15 = vector.shape_cast %4 : vector<1x128xf32> to vector<1x1x128xf32>
    %16 = vector.broadcast %15 : vector<1x1x128xf32> to vector<2x8x128xf32>
    %17 = arith.mulf %14, %16 : vector<2x8x128xf32>
    %cst_11 = arith.constant dense<0.000000e+00> : vector<2x8xf32>
    %18 = vector.multi_reduction <add>, %17, %cst_11 [2] : vector<2x8x128xf32> to vector<2x8xf32>
    %cst_12 = arith.constant dense<0xFF800000> : vector<2xf32>
    %19 = vector.multi_reduction <maximumf>, %18, %cst_12 [1] : vector<2x8xf32> to vector<2xf32>
    %20 = vector.shape_cast %19 : vector<2xf32> to vector<2x1xf32>
    %21 = vector.broadcast %20 : vector<2x1xf32> to vector<2x8xf32>
    %22 = arith.subf %18, %21 : vector<2x8xf32>
    %23 = math.exp %22 : vector<2x8xf32>
    %cst_13 = arith.constant dense<0.000000e+00> : vector<2xf32>
    %24 = vector.multi_reduction <add>, %23, %cst_13 [1] : vector<2x8xf32> to vector<2xf32>
    %25 = vector.shape_cast %24 : vector<2xf32> to vector<2x1xf32>
    %26 = vector.broadcast %25 : vector<2x1xf32> to vector<2x8xf32>
    %27 = arith.divf %23, %26 : vector<2x8xf32>
    %28 = vector.shape_cast %27 : vector<2x8xf32> to vector<2x1x8xf32>
    %29 = arith.truncf %28 : vector<2x1x8xf32> to vector<2x1x8xbf16>
    "tpu.trace_start"() <{level = 10 : i32, message = "bqs,bse->bqe"}> : () -> ()
    %cst_14 = arith.constant dense<0.000000e+00> : vector<2x1x128xf32>
    %30 = tpu.matmul %29, %0, %cst_14 {dimension_numbers = #tpu.dot_dimension_numbers<[2], [1], [1], [2], [0, 0, 0, 1, 1, 2], [0], [0]>} : vector<2x1x8xbf16>, vector<2x8x128xbf16>, vector<2x1x128xf32> -> vector<2x1x128xf32>
    "tpu.trace_stop"() : () -> ()
    %c0_15 = arith.constant 0 : index
    %c0_16 = arith.constant 0 : index
    %31 = vector.load %arg7[%c0_15, %c0_16] : memref<2x8xf32, #tpu.memory_space<vmem>>, vector<2x8xf32>
    tpu.vector_store %arg7[%c0_15, %c0_16], %27 {strides = array<i32>} : memref<2x8xf32, #tpu.memory_space<vmem>>, vector<2x8xf32>,
    %32 = vector.shape_cast %30 : vector<2x1x128xf32> to vector<2x128xf32>
    %c0_17 = arith.constant 0 : index
    %c0_18 = arith.constant 0 : index
    %33 = vector.load %arg6[%c0_17, %c0_18] : memref<2x128xf32, #tpu.memory_space<vmem>>, vector<2x128xf32>
    tpu.vector_store %arg6[%c0_17, %c0_18], %32 {strides = array<i32>} : memref<2x128xf32, #tpu.memory_space<vmem>>, vector<2x128xf32>,
    return
  }
  func.func @transform_0(%arg0: i32) -> (i32, i32, i32) {
    %c0_i32 = arith.constant 0 : i32
    %c0_i32_0 = arith.constant 0 : i32
    %c0_i32_1 = arith.constant 0 : i32
    return %arg0, %c0_i32, %c0_i32_0 : i32, i32, i32
  }
  func.func @transform_1(%arg0: i32) -> (i32, i32) {
    %c0_i32 = arith.constant 0 : i32
    %c0_i32_0 = arith.constant 0 : i32
    return %arg0, %c0_i32 : i32, i32
  }
  func.func @transform_2(%arg0: i32) -> (i32, i32) {
    %c0_i32 = arith.constant 0 : i32
    %c0_i32_0 = arith.constant 0 : i32
    %c0_i32_1 = arith.constant 0 : i32
    return %c0_i32, %c0_i32_0 : i32, i32
  }
  func.func @transform_3(%arg0: i32) -> (i32, i32) {
    %c0_i32 = arith.constant 0 : i32
    %c0_i32_0 = arith.constant 0 : i32
    %c0_i32_1 = arith.constant 0 : i32
    return %c0_i32, %c0_i32_0 : i32, i32
  }
  func.func @transform_4(%arg0: i32) -> (i32, i32) {
    %c0_i32 = arith.constant 0 : i32
    %c0_i32_0 = arith.constant 0 : i32
    %c0_i32_1 = arith.constant 0 : i32
    return %c0_i32, %c0_i32_0 : i32, i32
  }
  func.func @transform_5(%arg0: i32) -> (i32, i32) {
    %c0_i32 = arith.constant 0 : i32
    %c0_i32_0 = arith.constant 0 : i32
    return %arg0, %c0_i32 : i32, i32
  }
  func.func @transform_6(%arg0: i32) -> (i32, i32) {
    %c0_i32 = arith.constant 0 : i32
    %c0_i32_0 = arith.constant 0 : i32
    return %arg0, %c0_i32 : i32, i32
  }
}

</mosaic_0001>

<bundles_post_ra>
// kernel: tpu_custom_call.1
= control target key start
LH: loop header
LB: loop body
LE: loop exit
PB: predicated region body
PF: predicated region fallthrough
CT: control target
= control target key end

     0   :  { %12 = vsyncpa [#allocation3], 0  ;;  %s872_s0 = inlined_call_operand.hbm [shape: bf16[2,8,128], index: 0, kind: input, shape index: {}]   ;;  %s873_s1 = inlined_call_operand.vmem [shape: bf16[2,32], index: 1, kind: input, shape index: {}]   ;;  %s874_s2 = inlined_call_operand.hbm [shape: bf16[128,128], index: 2, kind: input, shape index: {}]   ;;  %s875_s3 = inlined_call_operand.hbm [shape: bf16[32,128], index: 3, kind: input, shape index: {}]   ;;  %s876_s4 = inlined_call_operand.vmem [shape: f32[1,128], index: 4, kind: input, shape index: {}]   ;;  %s877_s5 = inlined_call_operand.hbm [shape: f32[2,128], index: 5, kind: output, shape index: {0}]   ;;  %s878_s6 = inlined_call_operand.hbm [shape: f32[2,8], index: 6, kind: output, shape index: {1}]  }
   0x1   :  { %13 = vsyncpa [#allocation6], 0 }
   0x2   :  { %14 = vsyncpa [#allocation4], 0 }
   0x3   :  { %15 = vsyncpa [#allocation10], 0  ;;  %s752_s21 = smov [#allocation5]   ;;  %s753_s23 = smov [#allocation2]  }
   0x4   :  { %s35_s22 = sshll.u32 %s752_s21, 4  ;;  %s21_s24 = sshll.u32 %s753_s23, 4  ;;  %s36_s22 = int_to_ptr.vmem [resolvable:$true] %s35_s22  ;;  %s22_s24 = int_to_ptr.vmem [resolvable:$true] %s21_s24 }
   0x5   :  { %s652_s25 = scalar_lea.vmem %s36_s22, 1024  ;;  %p657_p1 = scmp.lt.s32.totalorder %s36_s22, %s36_s22 }
   0x6   :  { %p653_p0 = scmp.ne.s32.totalorder %s36_s22, %s652_s25  ;;  %p658_p2 = scmp.lt.s32.totalorder %s652_s25, %s652_s25 }
   0x8   :  { %p659_p3 = por %p658_p2, %p657_p1 }
   0xa   :  { %p660_p4 = pnand %p659_p3, %p653_p0 }
   0xc   :  { %663 = shalt.err (!%p660_p4)
}
   0xd   :  { %s754_s26 = smov 64   ;;  %s755_s27 = smov 4  }
   0xe   :  { %41 = dma.hbm_to_vmem [thread:$0]  %s874_s2, 1024, %s36_s22, [#allocation6], %s754_s26, %s754_s26, %s755_s27  }
   0xf   :  { %s672_s30 = scalar_lea.vmem %s22_s24, 128  ;;  %p677_p6 = scmp.lt.s32.totalorder %s22_s24, %s22_s24 }
  0x10   :  { %p673_p5 = scmp.ne.s32.totalorder %s22_s24, %s672_s30  ;;  %p678_p7 = scmp.lt.s32.totalorder %s672_s30, %s672_s30 }
  0x12   :  { %p679_p8 = por %p678_p7, %p677_p6 }
  0x14   :  { %p680_p9 = pnand %p679_p8, %p673_p5 }
  0x16   :  { %683 = shalt.err (!%p680_p9)
}
  0x17   :  { %27 = dma.hbm_to_vmem [thread:$0]  %s872_s0, 128, %s22_s24, [#allocation3], %s754_s26, %s754_s26, %s755_s27  }
  0x18   :  { %s756_s9 = smov [#allocation7]  }
  0x19   :  { %s47_s10 = sshll.u32 %s756_s9, 4  ;;  %s48_s10 = int_to_ptr.vmem [resolvable:$true] %s47_s10 }
  0x1a   :  { %s692_s11 = scalar_lea.vmem %s48_s10, 256  ;;  %p697_p11 = scmp.lt.s32.totalorder %s48_s10, %s48_s10 }
  0x1b   :  { %p693_p10 = scmp.ne.s32.totalorder %s48_s10, %s692_s11  ;;  %p698_p12 = scmp.lt.s32.totalorder %s692_s11, %s692_s11 }
  0x1d   :  { %p699_p13 = por %p698_p12, %p697_p11 }
  0x1f   :  { %p700_p0 = pnand %p699_p13, %p693_p10 }
  0x21   :  { %703 = shalt.err (!%p700_p0)
}
  0x22   :  { %53 = dma.hbm_to_vmem [thread:$0]  %s875_s3, 256, %s48_s10, [#allocation6], %s754_s26, %s754_s26, %s755_s27  }
  0x23   :  { %744 = dma.done.wait [#allocation3], 128  }
  0x24   :  { %745 = vsyncadd [#allocation3], 4294967168 }
  0x25   :  { %746 = dma.done.wait [#allocation6], 1280  }
  0x26   :  { %747 = vsyncadd [#allocation6], 4294966016  ;;  %v757_v0 = vmov 0.0   ;;  %vm758_vm0 = vmmov 0   ;;  %v621_v1 = vld [vmem:[#allocation5 + $0x38] sm:$0xff]   ;;  %v622_v2 = vld [vmem:[#allocation5 + $0x30] sm:$0xff]   ;;  %v245_v17 = vlaneseq }
  0x27   :  { %568 = vmatprep.subr.bf16.mxu0 %v757_v0  ;;  %588 = vmatprep.subr.bf16.mxu1 %v757_v0  ;;  %v625_v3 = vld [vmem:[#allocation7 + $0x8] sm:$0xff]   ;;  %v627_v5 = vld [vmem:[#allocation7] sm:$0xff]   ;;  %v68_v7 = vld [vmem:[%s873_s1] sm:$0x1]  ;;  %vm197_vm1 = vcmask 261120   ;;  %vm306_vm2 = vcmask 1041409  }
  0x28   :  { %592 = vmatprep.mubr.msk.bf16.mxu1 %vm758_vm0, %v757_v0  ;;  %584 = vmatprep.mubr.msk.bf16.mxu0 %vm758_vm0, %v757_v0  ;;  %v623_v4 = vld [vmem:[#allocation5 + $0x28] sm:$0xff]   ;;  %v624_v6 = vld [vmem:[#allocation5 + $0x20] sm:$0xff]   ;;  %v626_v8 = vld [vmem:[#allocation5 + $0x18] sm:$0xff]   ;;  %v759_v15 = vmov 1966171168   ;;  %v833_v20 = vshrl.u32 %v245_v17, 7 }
  0x29   :  { %569 = vmatpush3.bf16.msra.mxu0 %v621_v1  ;;  %589 = vmatpush3.bf16.msra.mxu1 %v625_v3  ;;  %v628_v9 = vld [vmem:[#allocation5 + $0x10] sm:$0xff]   ;;  %v629_v10 = vld [vmem:[#allocation5 + $0x8] sm:$0xff]   ;;  %v630_v11 = vld [vmem:[#allocation5] sm:$0xff]   ;;  %v243_v16 = vunpack.c.l.s4 %v759_v15  ;;  %v297_v47 = vand.u32 127, %v245_v17  ;;  %vm309_vm3 = vcmask 58368   ;;  %v760_v55 = vmov 0  }
  0x2a   :  { %570 = vmatprep.subr.bf16.mxu0 %v757_v0  ;;  %590 = vmatprep.subr.bf16.mxu1 %v757_v0  ;;  %v826_v12 = vld [vmem:[#allocation2] sm:$0xf]  ;;  %v828_v13 = vld [vmem:[#allocation2 + $0x4] sm:$0xf]  ;;  %v266_v27 = vsub.s32 0, %v833_v20  ;;  %v320_v56 = vsub.s32 1, %v833_v20 }
  0x2b   :  { %v537_v14 = vcombine.low %v826_v12, %v828_v13  ;;  %v244_v19 = vunpack.c.0.s8 %v243_v16  ;;  %v549_v41 = vld [vmem:[%s876_s4] ss:$0 sm:$0xff]  ;;  %v841_v49 = vsub.s32 %v297_v47, %v833_v20  ;;  %620 = vset.pattern.permute.xlu0 %v760_v55  ;;  %619 = vset.pattern.permute.xlu1 %v760_v55  ;;  %vm382_vm4 = vcmask 1043456   ;;  %s761_s4 = smov [#allocation9]  }
  0x2c   :  { %v384_v15 = vsel %vm382_vm4, %v826_v12, 0  ;;  %vm378_vm5 = vcmask 64512   ;;  %v440_v12 = vsel %vm382_vm4, %v828_v13, 0  ;;  %s523_s14 = sshll.u32 %s761_s4, 4  ;;  %s524_s14 = int_to_ptr.vmem [resolvable:$true] %s523_s14 }
  0x2d   :  { %571 = vmatpush3.bf16.msra.mxu0 %v622_v2  ;;  %591 = vmatpush3.bf16.msra.mxu1 %v627_v5  ;;  %v247_v23 = vsub.s32 %v244_v19, %v833_v20  ;;  %s704_s15 = scalar_lea.vmem %s524_s14, 32  ;;  %p709_p2 = scmp.lt.s32.totalorder %s524_s14, %s524_s14 }
  0x2e   :  { %572 = vmatprep.subr.bf16.mxu0 %v757_v0  ;;  %596 = vmatprep.subr.bf16.mxu1 %v757_v0  ;;  %p705_p1 = scmp.ne.s32.totalorder %s524_s14, %s704_s15  ;;  %p710_p3 = scmp.lt.s32.totalorder %s704_s15, %s704_s15 }
  0x30   :  { %593 = vmatmul.mubr.msk.bf16.vlgmr.msra.gmra.mxu1 %vm197_vm1, %v68_v7  ;;  %p711_p4 = por %p710_p3, %p709_p2 }
  0x31   :  { %573 = vmatpush3.bf16.msra.mxu0 %v623_v4  ;;  %598 = vmatprep.mubr.msk.bf16.mxu1 %vm758_vm0, %v757_v0 }
  0x32   :  { %574 = vmatprep.subr.bf16.mxu0 %v757_v0  ;;  %597 = vmatpush3.bf16.msra.mxu1 %v384_v15  ;;  %p712_p5 = pnand %p711_p4, %p705_p1 }
  0x33   :  { %602 = vmatprep.subr.bf16.mxu1 %v757_v0 }
  0x35   :  { %575 = vmatpush3.bf16.msra.mxu0 %v624_v6 }
  0x36   :  { %576 = vmatprep.subr.bf16.mxu0 %v757_v0 }
  0x39   :  { %577 = vmatpush3.bf16.msra.mxu0 %v626_v8 }
  0x3a   :  { %578 = vmatprep.subr.bf16.mxu0 %v757_v0 }
  0x3d   :  { %579 = vmatpush3.bf16.msra.mxu0 %v628_v9 }
  0x3e   :  { %580 = vmatprep.subr.bf16.mxu0 %v757_v0 }
  0x41   :  { %581 = vmatpush3.bf16.msra.mxu0 %v629_v10 }
  0x42   :  { %582 = vmatprep.subr.bf16.mxu0 %v757_v0 }
  0x45   :  { %583 = vmatpush3.bf16.msra.mxu0 %v630_v11 }
  0x48   :  { %585 = vmatmul.mubr.bf16.vlgmr.msra.gmra.mxu0 %v537_v14 }
  0xf0   :  { %v235_v18 = vpop.f32.mrf.mxu1 }
  0xf1   :  { %v248_v25 = vrot.slane %v235_v18, %v247_v23 }
  0xf2   :  { %v594_v21 = vpop.f32.mrf.mxu1 }
  0xf3   :  { %v256_v26 = vrot.slane %v248_v25, %v247_v23  ;;  %v249_v28 = vcombine.high %v248_v25, %v248_v25 }
  0xf4   :  { %v238_v22 = vpop.f32.mrf.mxu1 }
  0xf5   :  { %v267_v29 = vrot.slane %v256_v26, %v266_v27  ;;  %v263_v30 = vrot.slane %v249_v28, %v247_v23 }
  0xf6   :  { %v595_v24 = vpop.f32.mrf.mxu1 }
  0xf7   :  { %v271_v35 = vrot.slane %v263_v30, %v266_v27 }
 0x108   :  { %v178_v31 = vpop.f32.mrf.mxu0 }
 0x109   :  { %v274_v32 = vadd.f32 %v267_v29, %v178_v31 }
 0x10a   :  { %v586_v33 = vpop.f32.mrf.mxu0 }
 0x10b   :  { %v276_v34 = vpack.c.bf16 %v274_v32, %v274_v32 }
 0x10c   :  { %v181_v36 = vpop.f32.mrf.mxu0 }
 0x10d   :  { %632 = vtanh.bf16 %v276_v34  ;;  %v275_v37 = vadd.f32 %v271_v35, %v181_v36 }
 0x10e   :  { %v587_v38 = vpop.f32.mrf.mxu0 }
 0x10f   :  { %v277_v39 = vpack.c.bf16 %v275_v37, %v275_v37 }
 0x111   :  { %634 = vtanh.bf16 %v277_v39 }
 0x11b   :  { %v633_v40 = vpop.eup %632 }
 0x11c   :  { %v280_v42 = vunpack.c.l.bf16 %v633_v40 }
 0x11e   :  { %v288_v43 = vmul.f32 %v549_v41, %v280_v42 }
 0x11f   :  { %v635_v44 = vpop.eup %634 }
 0x120   :  { %290 = vadd.xlane.f32.xlu0 %v288_v43  ;;  %v281_v45 = vunpack.c.l.bf16 %v635_v44 }
 0x122   :  { %v289_v46 = vmul.f32 %v549_v41, %v281_v45 }
 0x124   :  { %292 = vadd.xlane.f32.xlu0 %v289_v46 }
 0x1a9   :  { %v291_v48 = vpop.xlane.xlu0 %290 }
 0x1aa   :  { %v301_v51 = vrot.slane %v291_v48, %v841_v49 }
 0x1ad   :  { %v293_v50 = vpop.xlane.xlu0 %292 }
 0x1ae   :  { %v305_v52 = vrot.slane %v293_v50, %v841_v49 }
 0x1b0   :  { %v307_v53 = vsel %vm306_vm2, %v305_v52, %v301_v51 }
 0x1b1   :  { %v310_v54 = vsel %vm309_vm3, %v307_v53, -inf }
 0x1b2   :  { %311 = vmax.xlane.f32.xlu1 %v310_v54 }
 0x23b   :  { %v312_v57 = vpop.xlane.xlu1 %311 }
 0x23c   :  { %v317_v58 = vrot.slane %v312_v57, %v266_v27  ;;  %v321_v59 = vrot.slane %v312_v57, %v320_v56 }
 0x23e   :  { %v324_v60 = vsub.f32 %v291_v48, %v317_v58  ;;  %v325_v61 = vsub.f32 %v293_v50, %v321_v59 }
 0x240   :  { %v326_v62 = vmul.f32 1.442695, %v324_v60  ;;  %v328_v63 = vmul.f32 1.442695, %v325_v61 }
 0x242   :  { %636 = vpow2.f32 %v326_v62 }
 0x243   :  { %638 = vpow2.f32 %v328_v63 }
 0x24f   :  { %v637_v1 = vpop.eup %636 }
 0x250   :  { %v639_v2 = vpop.eup %638  ;;  %333 = vperm.xlu1 %619, %v637_v1  }
 0x251   :  { %336 = vperm.xlu0 %620, %v639_v2  }
 0x2cb   :  { %v334_v3 = vpop.permute.xlu1 %333 }
 0x2cc   :  { %v337_v4 = vpop.permute.xlu0 %336  ;;  %v341_v5 = vrot.slane %v334_v3, %v841_v49 }
 0x2cd   :  { %v345_v6 = vrot.slane %v337_v4, %v841_v49 }
 0x2cf   :  { %v346_v7 = vsel %vm306_vm2, %v345_v6, %v341_v5 }
 0x2d0   :  { %v348_v8 = vsel %vm309_vm3, %v346_v7, 0.0 }
 0x2d1   :  { %349 = vadd.xlane.f32.xlu1 %v348_v8 }
 0x35a   :  { %v350_v9 = vpop.xlane.xlu1 %349 }
 0x35b   :  { %v355_v10 = vrot.slane %v350_v9, %v266_v27  ;;  %v359_v11 = vrot.slane %v350_v9, %v320_v56 }
 0x35d   :  { %640 = vrcp.f32 %v355_v10 }
 0x35e   :  { %642 = vrcp.f32 %v359_v11 }
 0x36a   :  { %v641_v14 = vpop.eup %640 }
 0x36b   :  { %v643_v16 = vpop.eup %642  ;;  %v363_v17 = vmul.f32 %v641_v14, %v637_v1 }
 0x36c   :  { %v365_v18 = vmul.f32 %v643_v16, %v639_v2 }
 0x36d   :  { %485 = vperm.xlu1 %619, %v363_v17   ;;  %v366_v19 = vpack.c.bf16 %v363_v17, %v363_v17 }
 0x36e   :  { %v367_v21 = vpack.c.bf16 %v365_v18, %v365_v18 }
 0x36f   :  { %v369_v20 = vunpack.c.l.b16 %v366_v19 }
 0x370   :  { %v427_v22 = vunpack.c.l.b16 %v367_v21 }
 0x371   :  { %371 = vperm.xlu0 %620, %v369_v20  }
 0x375   :  { %429 = vperm.xlu0 %620, %v427_v22  }
 0x379   :  { %488 = vperm.xlu0 %620, %v365_v18  }
 0x3e8   :  { %v486_v27 = vpop.permute.xlu1 %485 }
 0x3e9   :  { %v493_v30 = vrot.slane %v486_v27, %v841_v49 }
 0x3ec   :  { %v372_v23 = vpop.permute.xlu0 %371 }
 0x3ed   :  { %v376_v24 = vrot.slane %v372_v23, %v841_v49 }
 0x3ef   :  { %v377_v25 = vpack.c.b16 %v376_v24, %v376_v24 }
 0x3f0   :  { %v430_v26 = vpop.permute.xlu0 %429 }
 0x3f1   :  { %599 = vmatmul.mubr.msk.bf16.vlgmr.msra.gmra.mxu1 %vm378_vm5, %v377_v25  ;;  %v434_v28 = vrot.slane %v430_v26, %v841_v49 }
 0x3f2   :  { %603 = vmatpush3.bf16.msra.mxu1 %v440_v12  ;;  %604 = vmatprep.mubr.msk.bf16.mxu1 %vm758_vm0, %v757_v0 }
 0x3f3   :  { %v435_v32 = vpack.c.b16 %v434_v28, %v434_v28 }
 0x3f4   :  { %v489_v29 = vpop.permute.xlu0 %488 }
 0x3f5   :  { %v497_v31 = vrot.slane %v489_v29, %v841_v49 }
 0x3f7   :  { %v498_v33 = vsel %vm306_vm2, %v497_v31, %v493_v30 }
 0x3f8   :  { %500 = vst.msk [vmem:[#allocation9] sm:$0x3] %vm309_vm3, %v498_v33 }
 0x3f9   :  { %605 = vmatmul.mubr.msk.bf16.vlgmr.msra.gmra.mxu1 %vm378_vm5, %v435_v32 }
 0x3fa   :  { %715 = shalt.err (!%p712_p5)
}
 0x3fb   :  { %526 = dma.vmem_to_hbm [thread:$0]  %s524_s14, 32, %s878_s6, [#allocation10]  }
 0x3fc   :  { %s762_s18 = smov [#allocation8]  }
 0x3fd   :  { %s513_s19 = sshll.u32 %s762_s18, 4  ;;  %s514_s19 = int_to_ptr.vmem [resolvable:$true] %s513_s19 }
 0x3fe   :  { %s724_s20 = scalar_lea.vmem %s514_s19, 32  ;;  %p729_p7 = scmp.lt.s32.totalorder %s514_s19, %s514_s19 }
 0x3ff   :  { %p725_p6 = scmp.ne.s32.totalorder %s514_s19, %s724_s20  ;;  %p730_p8 = scmp.lt.s32.totalorder %s724_s20, %s724_s20 }
 0x401   :  { %p731_p9 = por %p730_p8, %p729_p7 }
 0x403   :  { %p732_p10 = pnand %p731_p9, %p725_p6 }
 0x4b1   :  { %v420_v0 = vpop.f32.mrf.mxu1 }
 0x4b3   :  { %v600_v13 = vpop.f32.mrf.mxu1 }
 0x4b5   :  { %v423_v34 = vpop.f32.mrf.mxu1 }
 0x4b7   :  { %v601_v35 = vpop.f32.mrf.mxu1 }
 0x4b9   :  { %v476_v36 = vpop.f32.mrf.mxu1 }
 0x4ba   :  { %v503_v37 = vrot.slane %v476_v36, 7 }
 0x4bb   :  { %v606_v38 = vpop.f32.mrf.mxu1 }
 0x4bc   :  { %v504_v39 = vsel %vm306_vm2, %v503_v37, %v420_v0 }
 0x4bd   :  { %v479_v40 = vpop.f32.mrf.mxu1  ;;  %506 = vst [vmem:[#allocation8] sm:$0x3] %v504_v39 }
 0x4be   :  { %735 = shalt.err (!%p732_p10)
}
 0x4bf   :  { %516 = dma.vmem_to_hbm [thread:$0]  %s514_s19, 32, %s877_s5, [#allocation4]   ;;  %v607_v41 = vpop.f32.mrf.mxu1 }
 0x4c0   :  { %748 = dma.done.wait [#allocation4], 32  }
 0x4c1   :  { %749 = vsyncadd [#allocation4], 4294967264 }
 0x4c2   :  { %750 = dma.done.wait [#allocation10], 32  }
 0x4c3   :  { %751 = vsyncadd [#allocation10], 4294967264 }
 0x4c4   :  { %533 = vsyncpa [#allocation3], 1 }
 0x4c5   :  { %534 = vsyncpa [#allocation6], 1 }
 0x4c6   :  { %535 = vsyncpa [#allocation4], 1 }
 0x4c7   :  { %536 = vsyncpa [#allocation10], 1 }

</bundles_post_ra>
